<compile_context>
chip_gen: v6e
topology: v6e:2x2x1
jax: 0.10.0
libtpu: 0.0.40
codegen_flags: <defaults>
</compile_context>

<pallas_src>
import jax
import jax.numpy as jnp
from jax import lax
from jax.experimental import pallas as pl
from jax.experimental.pallas import tpu as pltpu


def _cdiv(a, b):
    return -(-a // b)


def _round_up(x, m):
    return ((x + m - 1) // m) * m


def _vmem_budget_bytes():
    """Generation-aware VMEM budget: ~80% of physical per-core capacity."""
    try:
        cap = int(pltpu.get_tpu_info().vmem_capacity_bytes)
    except Exception:
        cap = 64 * 1024 * 1024  # conservative fallback (v7x per-TC size)
    return int(min(cap * 0.8, 110 * 1024 * 1024))


def _linear_block_kernel(x_ref, w_ref, b_ref, o_ref):
    # x_ref: (Cin, TP)  pixels on lanes, channels on sublanes (stored dtype)
    # w_ref: (TCo, Cin) BN-scale-folded 1x1 conv weight (MXU feed dtype)
    # b_ref: (TCo, 1)   folded BN bias (f32), broadcasts over pixel lanes
    # o_ref: (TCo, TP)  lane-dense output tile (full-width vst)
    y = lax.dot_general(
        w_ref[...], x_ref[...].astype(w_ref.dtype),     # cast on VPU, f32 MXU acc
        dimension_numbers=(((1,), (0,)), ((), ())),
        preferred_element_type=jnp.float32)
    o_ref[...] = (y + b_ref[...]).astype(o_ref.dtype)


_single_buffer_ok = True  # flipped off once if the runtime rejects pl.Buffered(1)


def linear_block(x_nchw, conv_w, bn_gamma, bn_beta, bn_mean, bn_var,
                 eps=1e-5, *, tile_p=1024, tile_co=None,
                 compute_dtype=jnp.bfloat16):
    """x_nchw: (N, Cin, H, W); conv_w: (Cout, Cin, 1, 1) (PyTorch layout).

    compute_dtype: MXU feed dtype (default bf16, f32 accumulate + f32 BN
    epilogue). Pass jnp.float32 for exact f32 module semantics.
    tile_co: optional hard cap on the resident Cout tile (auto otherwise).
    """
    global _single_buffer_ok

    N, Cin, H, W = x_nchw.shape
    Cout = conv_w.shape[0]
    assert conv_w.shape[1] == Cin and conv_w.shape[2:] == (1, 1), (
        "only the Linear_block default 1x1 / stride 1 / groups 1 path is implemented")

    out_dtype = x_nchw.dtype
    cdtype = jnp.dtype(compute_dtype)
    x_isz = jnp.dtype(x_nchw.dtype).itemsize
    w_isz = cdtype.itemsize
    o_isz = jnp.dtype(out_dtype).itemsize

    # ---- BN folding (f32); fold the per-channel scale into the weight ----
    scale = bn_gamma.astype(jnp.float32) / jnp.sqrt(bn_var.astype(jnp.float32) + eps)
    bias = (bn_beta.astype(jnp.float32) - bn_mean.astype(jnp.float32) * scale)
    w = (conv_w.reshape(Cout, Cin).astype(jnp.float32) * scale[:, None]).astype(cdtype)
    bias = bias.reshape(Cout, 1)                       # broadcasts over pixel lanes

    # ---- pixels-on-lanes layout: free reshape, NO pad / NO dtype cast ----
    P = H * W
    x = x_nchw.reshape(N, Cin, P)

    budget = _vmem_budget_bytes()
    lane = 128

    def pick_tiles(wbuf):
        # Pixel tile: lane aligned, no larger than the (lane-padded) pixel axis.
        tp = min(_round_up(tile_p, lane), _round_up(P, lane))

        # Cout tile: keep the whole folded weight resident unless it is too big
        # for the VMEM budget (or the caller capped it explicitly).
        if tile_co is not None:
            tco = min(Cout, max(8, _round_up(tile_co, 8)))
        else:
            tco = Cout
            if wbuf * Cout * (Cin * w_isz + lane * 4) > budget // 3:
                tco = min(Cout, 256)

        def need(tp_, tco_):
            return (2 * Cin * tp_ * x_isz                     # double-buffered x tiles
                    + 2 * tco_ * tp_ * o_isz                   # double-buffered out tiles
                    + wbuf * tco_ * (Cin * w_isz + lane * 4)   # weight + lane-padded bias
                    + (Cin + tco_) * tp_ * 4)                  # in-kernel f32 temporaries

        while need(tp, tco) > budget and tp > lane:
            tp = max(lane, _round_up(tp // 2, lane))
        while need(tp, tco) > budget and tco > 8:
            tco = max(8, _round_up(tco // 2, 8))

        # v7x has 2 TensorCores (parallel-axis sharding): ensure >= 2 grid steps.
        while N * _cdiv(Cout, tco) * _cdiv(P, tp) < 2 and tp > lane:
            tp = max(lane, _round_up(_cdiv(tp, 2), lane))

        return tp, tco, need(tp, tco)

    def run(single_buffer_invariants):
        wbuf = 1 if single_buffer_invariants else 2
        tp, tco, vmem_need = pick_tiles(wbuf)
        grid = (N, _cdiv(Cout, tco), _cdiv(P, tp))
        inv_mode = pl.Buffered(1) if single_buffer_invariants else None
        vmem_limit = int(min(max(budget, vmem_need * 5 // 4), 128 * 1024 * 1024))

        cost = pl.CostEstimate(
            flops=2 * N * P * Cin * Cout,
            transcendentals=0,
            bytes_accessed=(N * Cin * P * x_isz
                            + Cout * Cin * w_isz
                            + N * Cout * P * o_isz))

        return pl.pallas_call(
            _linear_block_kernel,
            out_shape=jax.ShapeDtypeStruct((N, Cout, P), out_dtype),
            grid=grid,
            in_specs=[
                # activation pixel tile (stored dtype, cast in-kernel)
                pl.BlockSpec((None, Cin, tp), lambda n, co, p: (n, 0, p)),
                # folded weight: invariant along the inner pixel axis
                pl.BlockSpec((tco, Cin), lambda n, co, p: (co, 0),
                             pipeline_mode=inv_mode),
                # folded bias
                pl.BlockSpec((tco, 1), lambda n, co, p: (co, 0),
                             pipeline_mode=inv_mode),
            ],
            out_specs=pl.BlockSpec((None, tco, tp), lambda n, co, p: (n, co, p)),
            compiler_params=pltpu.CompilerParams(
                dimension_semantics=("parallel", "parallel", "parallel"),
                vmem_limit_bytes=vmem_limit),
            cost_estimate=cost,
        )(x, w, bias)

    if _single_buffer_ok:
        try:
            out = run(True)
        except Exception:
            # Runtime without single-buffer pipeline_mode support: double-buffer.
            _single_buffer_ok = False
            out = run(False)
    else:
        out = run(False)

    return out.reshape(N, Cout, H, W)


def linear_block_ref(x_nchw, conv_w, bn_gamma, bn_beta, bn_mean, bn_var,
                     eps=1e-5):
    """Pure-JAX reference (1x1 conv + eval-mode BN)."""
    N, Cin, H, W = x_nchw.shape
    Cout = conv_w.shape[0]
    w_mat = conv_w.reshape(Cout, Cin)
    y = jnp.einsum('nchw,oc->nohw', x_nchw, w_mat)
    scale = (bn_gamma / jnp.sqrt(bn_var + eps)).reshape(1, Cout, 1, 1)
    bias = (bn_beta - bn_mean * (bn_gamma / jnp.sqrt(bn_var + eps))
            ).reshape(1, Cout, 1, 1)
    return y * scale + bias


if __name__ == "__main__":
    key = jax.random.PRNGKey(0)
    k_x, k_w, k_g, k_b, k_m, k_v, k_x2, k_w3 = jax.random.split(key, 8)

    # small shapes: batch=2, in_c=4, out_c=8, spatial=16x16
    N, Cin, Cout, H, W = 2, 4, 8, 16, 16

    x = jax.random.normal(k_x, (N, Cin, H, W), dtype=jnp.float32)
    conv_w = jax.random.normal(k_w, (Cout, Cin, 1, 1), dtype=jnp.float32) * 0.1
    bn_gamma = 1.0 + 0.1 * jax.random.normal(k_g, (Cout,), dtype=jnp.float32)
    bn_beta = 0.1 * jax.random.normal(k_b, (Cout,), dtype=jnp.float32)
    bn_mean = 0.1 * jax.random.normal(k_m, (Cout,), dtype=jnp.float32)
    bn_var = jnp.abs(jax.random.normal(k_v, (Cout,), dtype=jnp.float32)) + 0.5

    ref = linear_block_ref(x, conv_w, bn_gamma, bn_beta, bn_mean, bn_var)

    # exact f32 path: matches module semantics tightly
    out_f32 = linear_block(x, conv_w, bn_gamma, bn_beta, bn_mean, bn_var,
                           compute_dtype=jnp.float32)
    out_f32 = jax.block_until_ready(out_f32)
    assert out_f32.shape == (N, Cout, H, W)
    assert jnp.allclose(out_f32, ref, atol=1e-4, rtol=1e-4)

    # default bf16-MXU-feed path (f32 accumulate / f32 BN epilogue): perf mode
    out_bf16 = linear_block(x, conv_w, bn_gamma, bn_beta, bn_mean, bn_var)
    out_bf16 = jax.block_until_ready(out_bf16)
    assert jnp.allclose(out_bf16, ref, atol=5e-2, rtol=5e-2)

    # ragged spatial (H*W=49, not a multiple of 128): exercises the masked
    # edge-block path that replaced the wrapper pad + output slice
    H2, W2 = 7, 7
    x2 = jax.random.normal(k_x2, (N, Cin, H2, W2), dtype=jnp.float32)
    ref2 = linear_block_ref(x2, conv_w, bn_gamma, bn_beta, bn_mean, bn_var)
    out2 = linear_block(x2, conv_w, bn_gamma, bn_beta, bn_mean, bn_var,
                        compute_dtype=jnp.float32)
    out2 = jax.block_until_ready(out2)
    assert out2.shape == (N, Cout, H2, W2)
    assert jnp.allclose(out2, ref2, atol=1e-4, rtol=1e-4)

    # Cout-tiled path (grid over output channels, ragged last Cout block)
    Cout3 = 24
    conv_w3 = jax.random.normal(k_w3, (Cout3, Cin, 1, 1), dtype=jnp.float32) * 0.1
    g3 = jnp.ones((Cout3,), jnp.float32)
    b3 = jnp.zeros((Cout3,), jnp.float32)
    m3 = jnp.zeros((Cout3,), jnp.float32)
    v3 = jnp.ones((Cout3,), jnp.float32)
    ref3 = linear_block_ref(x, conv_w3, g3, b3, m3, v3)
    out3 = linear_block(x, conv_w3, g3, b3, m3, v3,
                        compute_dtype=jnp.float32, tile_co=16)
    out3 = jax.block_until_ready(out3)
    assert out3.shape == (N, Cout3, H, W)
    assert jnp.allclose(out3, ref3, atol=1e-4, rtol=1e-4)

    print("KERNEL_OK")
</pallas_src>

<mosaic_0001>
module attributes {stable_mosaic.version = 11 : i64} {
  func.func @_linear_block_kernel(%arg0: i32, %arg1: i32, %arg2: i32, %arg3: memref<1x4x256xf32, #tpu.memory_space<vmem>>, %arg4: memref<8x4xf32, #tpu.memory_space<vmem>>, %arg5: memref<8x1xf32, #tpu.memory_space<vmem>>, %arg6: memref<1x8x256xf32, #tpu.memory_space<vmem>>) attributes {dimension_semantics = [#tpu.dimension_semantics<parallel>, #tpu.dimension_semantics<parallel>, #tpu.dimension_semantics<parallel>], iteration_bounds = array<i64: 2, 1, 1>, scalar_prefetch = 0 : i64, scratch_operands = 0 : i64, tpu.core_type = #tpu.core_type<tc>, window_params = [{transform_indices = @transform_0, window_bounds = array<i64: 1, 4, 256>}, {pipeline_mode = #tpu.pipeline_mode<synchronous>, transform_indices = @transform_1, window_bounds = array<i64: 8, 4>}, {pipeline_mode = #tpu.pipeline_mode<synchronous>, transform_indices = @transform_2, window_bounds = array<i64: 8, 1>}, {transform_indices = @transform_3, window_bounds = array<i64: 1, 8, 256>}]} {
    %c0 = arith.constant 0 : index
    %c0_0 = arith.constant 0 : index
    %0 = vector.load %arg4[%c0, %c0_0] : memref<8x4xf32, #tpu.memory_space<vmem>>, vector<8x4xf32>
    %c0_1 = arith.constant 0 : index
    %c0_2 = arith.constant 0 : index
    %c0_3 = arith.constant 0 : index
    %1 = vector.load %arg3[%c0_1, %c0_2, %c0_3] : memref<1x4x256xf32, #tpu.memory_space<vmem>>, vector<1x4x256xf32>
    %2 = vector.shape_cast %1 : vector<1x4x256xf32> to vector<4x256xf32>
    %cst = arith.constant dense<0.000000e+00> : vector<8x256xf32>
    %3 = tpu.matmul %0, %2, %cst {dimension_numbers = #tpu.dot_dimension_numbers<[1], [0], [0], [1], [0, 0, 1, 1], [], []>} : vector<8x4xf32>, vector<4x256xf32>, vector<8x256xf32> -> vector<8x256xf32>
    %c0_4 = arith.constant 0 : index
    %c0_5 = arith.constant 0 : index
    %4 = vector.load %arg5[%c0_4, %c0_5] : memref<8x1xf32, #tpu.memory_space<vmem>>, vector<8x1xf32>
    %5 = vector.broadcast %4 : vector<8x1xf32> to vector<8x256xf32>
    %6 = arith.addf %3, %5 : vector<8x256xf32>
    %c0_6 = arith.constant 0 : index
    %c0_7 = arith.constant 0 : index
    %c0_8 = arith.constant 0 : index
    %7 = vector.load %arg6[%c0_6, %c0_7, %c0_8] : memref<1x8x256xf32, #tpu.memory_space<vmem>>, vector<1x8x256xf32>
    %8 = vector.shape_cast %7 : vector<1x8x256xf32> to vector<8x256xf32>
    %9 = vector.shape_cast %6 : vector<8x256xf32> to vector<1x8x256xf32>
    tpu.vector_store %arg6[%c0_6, %c0_7, %c0_8], %9 {strides = array<i32>} : memref<1x8x256xf32, #tpu.memory_space<vmem>>, vector<1x8x256xf32>,
    return
  }
  func.func @transform_0(%arg0: i32, %arg1: i32, %arg2: i32) -> (i32, i32, i32) {
    %c0_i32 = arith.constant 0 : i32
    %c0_i32_0 = arith.constant 0 : i32
    return %arg0, %c0_i32, %arg2 : i32, i32, i32
  }
  func.func @transform_1(%arg0: i32, %arg1: i32, %arg2: i32) -> (i32, i32) {
    %c0_i32 = arith.constant 0 : i32
    %c0_i32_0 = arith.constant 0 : i32
    return %arg1, %c0_i32 : i32, i32
  }
  func.func @transform_2(%arg0: i32, %arg1: i32, %arg2: i32) -> (i32, i32) {
    %c0_i32 = arith.constant 0 : i32
    %c0_i32_0 = arith.constant 0 : i32
    return %arg1, %c0_i32 : i32, i32
  }
  func.func @transform_3(%arg0: i32, %arg1: i32, %arg2: i32) -> (i32, i32, i32) {
    %c0_i32 = arith.constant 0 : i32
    return %arg0, %arg1, %arg2 : i32, i32, i32
  }
}

module attributes {stable_mosaic.version = 11 : i64} {
  func.func @_linear_block_kernel(%arg0: i32, %arg1: i32, %arg2: i32, %arg3: memref<1x4x256xf32, #tpu.memory_space<vmem>>, %arg4: memref<8x4xf32, #tpu.memory_space<vmem>>, %arg5: memref<8x1xf32, #tpu.memory_space<vmem>>, %arg6: memref<1x8x256xf32, #tpu.memory_space<vmem>>) attributes {dimension_semantics = [#tpu.dimension_semantics<parallel>, #tpu.dimension_semantics<parallel>, #tpu.dimension_semantics<parallel>], iteration_bounds = array<i64: 2, 1, 1>, scalar_prefetch = 0 : i64, scratch_operands = 0 : i64, tpu.core_type = #tpu.core_type<tc>, window_params = [{transform_indices = @transform_0, window_bounds = array<i64: 1, 4, 256>}, {transform_indices = @transform_1, window_bounds = array<i64: 8, 4>}, {transform_indices = @transform_2, window_bounds = array<i64: 8, 1>}, {transform_indices = @transform_3, window_bounds = array<i64: 1, 8, 256>}]} {
    %c0 = arith.constant 0 : index
    %c0_0 = arith.constant 0 : index
    %0 = vector.load %arg4[%c0, %c0_0] : memref<8x4xf32, #tpu.memory_space<vmem>>, vector<8x4xf32>
    %c0_1 = arith.constant 0 : index
    %c0_2 = arith.constant 0 : index
    %c0_3 = arith.constant 0 : index
    %1 = vector.load %arg3[%c0_1, %c0_2, %c0_3] : memref<1x4x256xf32, #tpu.memory_space<vmem>>, vector<1x4x256xf32>
    %2 = vector.shape_cast %1 : vector<1x4x256xf32> to vector<4x256xf32>
    %cst = arith.constant dense<0.000000e+00> : vector<8x256xf32>
    %3 = tpu.matmul %0, %2, %cst {dimension_numbers = #tpu.dot_dimension_numbers<[1], [0], [0], [1], [0, 0, 1, 1], [], []>} : vector<8x4xf32>, vector<4x256xf32>, vector<8x256xf32> -> vector<8x256xf32>
    %c0_4 = arith.constant 0 : index
    %c0_5 = arith.constant 0 : index
    %4 = vector.load %arg5[%c0_4, %c0_5] : memref<8x1xf32, #tpu.memory_space<vmem>>, vector<8x1xf32>
    %5 = vector.broadcast %4 : vector<8x1xf32> to vector<8x256xf32>
    %6 = arith.addf %3, %5 : vector<8x256xf32>
    %c0_6 = arith.constant 0 : index
    %c0_7 = arith.constant 0 : index
    %c0_8 = arith.constant 0 : index
    %7 = vector.load %arg6[%c0_6, %c0_7, %c0_8] : memref<1x8x256xf32, #tpu.memory_space<vmem>>, vector<1x8x256xf32>
    %8 = vector.shape_cast %7 : vector<1x8x256xf32> to vector<8x256xf32>
    %9 = vector.shape_cast %6 : vector<8x256xf32> to vector<1x8x256xf32>
    tpu.vector_store %arg6[%c0_6, %c0_7, %c0_8], %9 {strides = array<i32>} : memref<1x8x256xf32, #tpu.memory_space<vmem>>, vector<1x8x256xf32>,
    return
  }
  func.func @transform_0(%arg0: i32, %arg1: i32, %arg2: i32) -> (i32, i32, i32) {
    %c0_i32 = arith.constant 0 : i32
    %c0_i32_0 = arith.constant 0 : i32
    return %arg0, %c0_i32, %arg2 : i32, i32, i32
  }
  func.func @transform_1(%arg0: i32, %arg1: i32, %arg2: i32) -> (i32, i32) {
    %c0_i32 = arith.constant 0 : i32
    %c0_i32_0 = arith.constant 0 : i32
    return %arg1, %c0_i32 : i32, i32
  }
  func.func @transform_2(%arg0: i32, %arg1: i32, %arg2: i32) -> (i32, i32) {
    %c0_i32 = arith.constant 0 : i32
    %c0_i32_0 = arith.constant 0 : i32
    return %arg1, %c0_i32 : i32, i32
  }
  func.func @transform_3(%arg0: i32, %arg1: i32, %arg2: i32) -> (i32, i32, i32) {
    %c0_i32 = arith.constant 0 : i32
    return %arg0, %arg1, %arg2 : i32, i32, i32
  }
}

</mosaic_0001>

<bundles_post_ra>
// kernel: tpu_custom_call.1
= control target key start
LH: loop header
LB: loop body
LE: loop exit
PB: predicated region body
PF: predicated region fallthrough
CT: control target
= control target key end

     0   :  { %8 = vsyncpa [#allocation3], 0  ;;  %s750_s0 = inlined_call_operand.vmem [shape: f32[2,4,256], index: 0, kind: input, shape index: {}]   ;;  %s751_s1 = inlined_call_operand.vmem [shape: f32[8,4], index: 1, kind: input, shape index: {}]   ;;  %s752_s2 = inlined_call_operand.vmem [shape: f32[8,1], index: 2, kind: input, shape index: {}]   ;;  %s753_s3 = inlined_call_operand.hbm [shape: f32[2,8,256], index: 3, kind: output, shape index: {}]  }
   0x1   :  { %10 = vsyncpa [#allocation3 + $0x1], 0  ;;  %s645_s12 = smov 0   ;;  %s647_s13 = smov 0  }
   0x2   :  { %s649_s14 = smov 0   ;;  %s651_s15 = smov 0  }
   0x3   :  { %s653_s16 = smov 0   ;;  %s655_s17 = smov 0  }
   0x4 LB: > { %s465_s18 = sadd.s32 4294967295, %s620_s17   ;;  %s466_s19 = sadd.s32 4294967294, %s620_s17   ;;  %s620_s17 = sphi %s655_s17, %s16_s17   ;;  %s616_s16 = sphi %s653_s16, %s760_s16   ;;  %s612_s15 = sphi %s651_s15, %s759_s15   ;;  %s608_s14 = sphi %s649_s14, %s758_s14   ;;  %s604_s13 = sphi %s647_s13, %s757_s13   ;;  %s600_s12 = sphi %s645_s12, %s756_s12  }
   0x5   : > { %s35_s20 = sadd.s32 1, %s616_s16  ;;  %s126_s21 = sadd.s32 1, %s608_s14 }
   0x6   : > { %p37_p0 = scmp.ge.s32.totalorder %s35_s20, 2  ;;  %p136_p1 = scmp.ne.s32.totalorder %s608_s14, %s604_s13 }
   0x7   : > { %p137_p2 = scmp.eq.s32.totalorder %s465_s18, 1  ;;  %p142_p3 = scmp.ne.s32.totalorder %s604_s13, %s600_s12 }
   0x8   : > { %s762_s20 = smov (%p37_p0, %s35_s20), 0  ;;  %p143_p5 = scmp.eq.s32.totalorder %s466_s19, 1 }
   0x9   : > { %p685_p4 = por %p137_p2, %p136_p1  ;;  %s119_s23 = ssub.s32 %s616_s16, %s762_s20 }
   0xa   : > { %p471_p6 = scmp.ge.s32.totalorder %s620_s17, 1  ;;  %p124_p7 = scmp.eq.s32.totalorder %s119_s23, 0 }
   0xb   : > { %p692_p8 = por %p143_p5, %p142_p3  ;;  %p188_p9 = scmp.lt.s32.totalorder %s620_s17, 3 }
   0xc   : > { %s698_s25 = scalar_select %p124_p7, %s608_s14, %s126_s21  }
   0xd   : > { %p189_p10 = pnand %p471_p6, %p188_p9 }
   0xe   : > { %p225_p11 = scmp.lt.s32.totalorder (!%p189_p10), %s612_s15, 1  ;;  %s221_s8 = sand.u32 (!%p189_p10), 1, %s604_s13  }
   0xf   : > { %192 = sbr.rel (%p189_p10) target bundleno = 239 (0xef), region = 32  ;;  %s472_s9 = sshll.u32 (!%p189_p10), %s221_s8, 4 }
  0x10   : > { %s484_s10 = sshll.u32 (!%p189_p10), %s612_s15, 8  ;;  %s223_s11 = scalar_lea.vmem (!%p189_p10), [#allocation2], %s472_s9 }
  0x11   : > { %s354_s18 = sshll.u32 (!%p189_p10), %s223_s11, 4  ;;  %s352_s23 = scalar_lea.hbm (!%p189_p10), %s753_s3, %s484_s10  ;;  %s355_s18 = int_to_ptr.vmem [resolvable:$true] %s354_s18 }
  0x12   : > { %s336_s26 = scalar_lea.sflag (!%p189_p10), [#allocation3], %s221_s8  ;;  %s544_s27 = scalar_lea.vmem (!%p189_p10), %s355_s18, 256 }
  0x13   : > { %p545_p12 = scmp.ne.s32.totalorder (!%p189_p10), %s355_s18, %s544_s27 }
  0x14   : > { %v622_v0 = vmov 0.0   ;;  %v623_v1 = vmov 0   ;;  %v245_v2 = vld [vmem:[%s752_s2] sm:$0xff]  ;;  %s226_s28 = scalar_select %p225_p11, %s612_s15, 1  ;;  %vm257_vm0 = vcmask 1043456   ;;  %vm253_vm1 = vcmask 31744  }
  0x15   : > { %326 = vmatprep.mubr.f32.mxu0 %v622_v0  ;;  %542 = vset.pattern.permute.xlu0 %v623_v1  ;;  %v243_v5 = vld [vmem:[%s751_s1] sm:$0xff]  ;;  %p546_p13 = pnand %p545_p12, %p685_p4 }
  0x16   : > { %248 = vperm.xlu0 %542, %v245_v2   ;;  %s483_s29 = sshll.u32 %s226_s28, 3  ;;  %s624_s28 = smov [#allocation2]  }
  0x17   : > { %s232_s5 = scalar_lea.vmem %s750_s0, %s483_s29  ;;  %p547_p0 = pneg %p546_p13 }
  0x18   : > { %v244_v3 = vld [vmem:[%s232_s5] sm:$0xff]  ;;  %s548_s15 = sshll.u32 %s624_s28, 4  ;;  %s549_s15 = int_to_ptr.vmem [resolvable:$false] %s548_s15 }
  0x19   : > { %v252_v4 = vcombine.high %v244_v3, %v244_v3  ;;  %s550_s29 = scalar_lea.vmem %s549_s15, 512  ;;  %p551_p1 = scmp.lt.s32.totalorder %s355_s18, %s549_s15 }
  0x1a   : > { %p552_p2 = scmp.lt.s32.totalorder %s550_s29, %s544_s27 }
  0x1b   : > { %475 = vmatprep.subr.msk.mxu0 %vm257_vm0, %v252_v4 }
  0x1c   : > { %476 = vmatpush1.msk.msra.mxu0 %vm257_vm0, %v244_v3  ;;  %p553_p3 = por %p552_p2, %p551_p1 }
  0x1d   : > { %477 = vmatmul.mubr.msk.f32.vlgmr.msra.gmra.mxu0 %vm253_vm1, %v243_v5 }
  0x1e   : > { %p554_p5 = pnand %p553_p3, %p547_p0 }
  0x91   : > { %v249_v6 = vpop.permute.xlu0 %248 }
  0xdd   : > { %v328_v7 = vpop.f32.mrf.mxu0 }
  0xde   : > { %v329_v8 = vadd.f32 %v328_v7, %v249_v6 }
  0xdf   : > { %v330_v9 = vpop.f32.mrf.mxu0 }
  0xe0   : > { %333 = vst [vmem:[%s223_s11] sm:$0xff] %v329_v8  ;;  %v331_v10 = vadd.f32 %v330_v9, %v249_v6 }
  0xe2   : > { %334 = vst [vmem:[%s223_s11 + $0x8] sm:$0xff] %v331_v10 }
  0xe3   : > { %557 = shalt.err (!%p554_p5)
}
  0xe4   : > { %s558_s30 = scalar_lea.hbm %s352_s23, 256  ;;  %s562_s6 = scalar_lea.hbm %s753_s3, 512 }
  0xe5   : > { %p559_p6 = scmp.ne.s32.totalorder %s352_s23, %s558_s30  ;;  %p563_p10 = scmp.lt.s32.totalorder %s352_s23, %s753_s3 }
  0xe6   : > { %p564_p11 = scmp.lt.s32.totalorder %s562_s6, %s558_s30 }
  0xe7   : > { %p560_p7 = pnand %p559_p6, %p685_p4 }
  0xe8   : > { %p565_p12 = por %p564_p11, %p563_p10 }
  0xe9   : > { %p561_p9 = pneg %p560_p7 }
  0xeb   : > { %p566_p13 = pnand %p565_p12, %p561_p9 }
  0xed   : > { %569 = shalt.err (!%p566_p13)
}
  0xee   : > { %485 = dma.vmem_to_hbm [thread:$0]  (%p685_p4), %s355_s18, 256, %s352_s23, %s336_s26  }
  0xef PF: > { %p491_p0 = scmp.ge.s32.totalorder %s620_s17, 2  ;;  %s366_s9 = sand.u32 1, %s600_s12  }
  0xf0   : > { %s367_s10 = scalar_lea.sflag [#allocation3], %s366_s9 }
  0xf1   : > { %p488_p1 = pnand %p491_p0, %p692_p8 }
  0xf3   : > { %p489_p2 = pneg %p488_p1 }
  0xf5   : > { %595 = dma.done.wait (%p489_p2), %s367_s10, 256  }
  0xf6   : > { %597 = vsyncadd (%p489_p2), %s367_s10, 4294967040  ;;  %s16_s17 = sadd.s32 1, %s620_s17   ;;  %s756_s12 = smov %s604_s13 }
  0xf7   : > { %p13_p3 = scmp.ge.s32.totalorder %s16_s17, 4   ;;  %s757_s13 = smov %s608_s14 }
  0xf8   : > { %s758_s14 = smov %s698_s25  ;;  %s759_s15 = smov %s616_s16 }
  0xf9   : > { %s760_s16 = smov %s762_s20  ;;  %15 = sbr.rel (!%p13_p3) target bundleno = 4 (0x4), region = 73 }
  0xfe   :  { %372 = vsyncpa [#allocation3], 1 }
  0xff   :  { %374 = vsyncpa [#allocation3 + $0x1], 1 }

// kernel: tpu_custom_call.1
= control target key start
LH: loop header
LB: loop body
LE: loop exit
PB: predicated region body
PF: predicated region fallthrough
CT: control target
= control target key end

     0   :  { %8 = vsyncpa [#allocation3], 0  ;;  %s750_s0 = inlined_call_operand.vmem [shape: f32[2,4,256], index: 0, kind: input, shape index: {}]   ;;  %s751_s1 = inlined_call_operand.vmem [shape: f32[8,4], index: 1, kind: input, shape index: {}]   ;;  %s752_s2 = inlined_call_operand.vmem [shape: f32[8,1], index: 2, kind: input, shape index: {}]   ;;  %s753_s3 = inlined_call_operand.hbm [shape: f32[2,8,256], index: 3, kind: output, shape index: {}]  }
   0x1   :  { %10 = vsyncpa [#allocation3 + $0x1], 0  ;;  %s645_s12 = smov 0   ;;  %s647_s13 = smov 0  }
   0x2   :  { %s649_s14 = smov 0   ;;  %s651_s15 = smov 0  }
   0x3   :  { %s653_s16 = smov 0   ;;  %s655_s17 = smov 0  }
   0x4 LB: > { %s465_s18 = sadd.s32 4294967295, %s620_s17   ;;  %s466_s19 = sadd.s32 4294967294, %s620_s17   ;;  %s620_s17 = sphi %s655_s17, %s16_s17   ;;  %s616_s16 = sphi %s653_s16, %s760_s16   ;;  %s612_s15 = sphi %s651_s15, %s759_s15   ;;  %s608_s14 = sphi %s649_s14, %s758_s14   ;;  %s604_s13 = sphi %s647_s13, %s757_s13   ;;  %s600_s12 = sphi %s645_s12, %s756_s12  }
   0x5   : > { %s35_s20 = sadd.s32 1, %s616_s16  ;;  %s126_s21 = sadd.s32 1, %s608_s14 }
   0x6   : > { %p37_p0 = scmp.ge.s32.totalorder %s35_s20, 2  ;;  %p136_p1 = scmp.ne.s32.totalorder %s608_s14, %s604_s13 }
   0x7   : > { %p137_p2 = scmp.eq.s32.totalorder %s465_s18, 1  ;;  %p142_p3 = scmp.ne.s32.totalorder %s604_s13, %s600_s12 }
   0x8   : > { %s762_s20 = smov (%p37_p0, %s35_s20), 0  ;;  %p143_p5 = scmp.eq.s32.totalorder %s466_s19, 1 }
   0x9   : > { %p685_p4 = por %p137_p2, %p136_p1  ;;  %s119_s23 = ssub.s32 %s616_s16, %s762_s20 }
   0xa   : > { %p471_p6 = scmp.ge.s32.totalorder %s620_s17, 1  ;;  %p124_p7 = scmp.eq.s32.totalorder %s119_s23, 0 }
   0xb   : > { %p692_p8 = por %p143_p5, %p142_p3  ;;  %p188_p9 = scmp.lt.s32.totalorder %s620_s17, 3 }
   0xc   : > { %s698_s25 = scalar_select %p124_p7, %s608_s14, %s126_s21  }
   0xd   : > { %p189_p10 = pnand %p471_p6, %p188_p9 }
   0xe   : > { %p225_p11 = scmp.lt.s32.totalorder (!%p189_p10), %s612_s15, 1  ;;  %s221_s8 = sand.u32 (!%p189_p10), 1, %s604_s13  }
   0xf   : > { %192 = sbr.rel (%p189_p10) target bundleno = 239 (0xef), region = 32  ;;  %s472_s9 = sshll.u32 (!%p189_p10), %s221_s8, 4 }
  0x10   : > { %s484_s10 = sshll.u32 (!%p189_p10), %s612_s15, 8  ;;  %s223_s11 = scalar_lea.vmem (!%p189_p10), [#allocation2], %s472_s9 }
  0x11   : > { %s354_s18 = sshll.u32 (!%p189_p10), %s223_s11, 4  ;;  %s352_s23 = scalar_lea.hbm (!%p189_p10), %s753_s3, %s484_s10  ;;  %s355_s18 = int_to_ptr.vmem [resolvable:$true] %s354_s18 }
  0x12   : > { %s336_s26 = scalar_lea.sflag (!%p189_p10), [#allocation3], %s221_s8  ;;  %s544_s27 = scalar_lea.vmem (!%p189_p10), %s355_s18, 256 }
  0x13   : > { %p545_p12 = scmp.ne.s32.totalorder (!%p189_p10), %s355_s18, %s544_s27 }
  0x14   : > { %v622_v0 = vmov 0.0   ;;  %v623_v1 = vmov 0   ;;  %v245_v2 = vld [vmem:[%s752_s2] sm:$0xff]  ;;  %s226_s28 = scalar_select %p225_p11, %s612_s15, 1  ;;  %vm257_vm0 = vcmask 1043456   ;;  %vm253_vm1 = vcmask 31744  }
  0x15   : > { %326 = vmatprep.mubr.f32.mxu0 %v622_v0  ;;  %542 = vset.pattern.permute.xlu0 %v623_v1  ;;  %v243_v5 = vld [vmem:[%s751_s1] sm:$0xff]  ;;  %p546_p13 = pnand %p545_p12, %p685_p4 }
  0x16   : > { %248 = vperm.xlu0 %542, %v245_v2   ;;  %s483_s29 = sshll.u32 %s226_s28, 3  ;;  %s624_s28 = smov [#allocation2]  }
  0x17   : > { %s232_s5 = scalar_lea.vmem %s750_s0, %s483_s29  ;;  %p547_p0 = pneg %p546_p13 }
  0x18   : > { %v244_v3 = vld [vmem:[%s232_s5] sm:$0xff]  ;;  %s548_s15 = sshll.u32 %s624_s28, 4  ;;  %s549_s15 = int_to_ptr.vmem [resolvable:$false] %s548_s15 }
  0x19   : > { %v252_v4 = vcombine.high %v244_v3, %v244_v3  ;;  %s550_s29 = scalar_lea.vmem %s549_s15, 512  ;;  %p551_p1 = scmp.lt.s32.totalorder %s355_s18, %s549_s15 }
  0x1a   : > { %p552_p2 = scmp.lt.s32.totalorder %s550_s29, %s544_s27 }
  0x1b   : > { %475 = vmatprep.subr.msk.mxu0 %vm257_vm0, %v252_v4 }
  0x1c   : > { %476 = vmatpush1.msk.msra.mxu0 %vm257_vm0, %v244_v3  ;;  %p553_p3 = por %p552_p2, %p551_p1 }
  0x1d   : > { %477 = vmatmul.mubr.msk.f32.vlgmr.msra.gmra.mxu0 %vm253_vm1, %v243_v5 }
  0x1e   : > { %p554_p5 = pnand %p553_p3, %p547_p0 }
  0x91   : > { %v249_v6 = vpop.permute.xlu0 %248 }
  0xdd   : > { %v328_v7 = vpop.f32.mrf.mxu0 }
  0xde   : > { %v329_v8 = vadd.f32 %v328_v7, %v249_v6 }
  0xdf   : > { %v330_v9 = vpop.f32.mrf.mxu0 }
  0xe0   : > { %333 = vst [vmem:[%s223_s11] sm:$0xff] %v329_v8  ;;  %v331_v10 = vadd.f32 %v330_v9, %v249_v6 }
  0xe2   : > { %334 = vst [vmem:[%s223_s11 + $0x8] sm:$0xff] %v331_v10 }
  0xe3   : > { %557 = shalt.err (!%p554_p5)
}
  0xe4   : > { %s558_s30 = scalar_lea.hbm %s352_s23, 256  ;;  %s562_s6 = scalar_lea.hbm %s753_s3, 512 }
  0xe5   : > { %p559_p6 = scmp.ne.s32.totalorder %s352_s23, %s558_s30  ;;  %p563_p10 = scmp.lt.s32.totalorder %s352_s23, %s753_s3 }
  0xe6   : > { %p564_p11 = scmp.lt.s32.totalorder %s562_s6, %s558_s30 }
  0xe7   : > { %p560_p7 = pnand %p559_p6, %p685_p4 }
  0xe8   : > { %p565_p12 = por %p564_p11, %p563_p10 }
  0xe9   : > { %p561_p9 = pneg %p560_p7 }
  0xeb   : > { %p566_p13 = pnand %p565_p12, %p561_p9 }
  0xed   : > { %569 = shalt.err (!%p566_p13)
}
  0xee   : > { %485 = dma.vmem_to_hbm [thread:$0]  (%p685_p4), %s355_s18, 256, %s352_s23, %s336_s26  }
  0xef PF: > { %p491_p0 = scmp.ge.s32.totalorder %s620_s17, 2  ;;  %s366_s9 = sand.u32 1, %s600_s12  }
  0xf0   : > { %s367_s10 = scalar_lea.sflag [#allocation3], %s366_s9 }
  0xf1   : > { %p488_p1 = pnand %p491_p0, %p692_p8 }
  0xf3   : > { %p489_p2 = pneg %p488_p1 }
  0xf5   : > { %595 = dma.done.wait (%p489_p2), %s367_s10, 256  }
  0xf6   : > { %597 = vsyncadd (%p489_p2), %s367_s10, 4294967040  ;;  %s16_s17 = sadd.s32 1, %s620_s17   ;;  %s756_s12 = smov %s604_s13 }
  0xf7   : > { %p13_p3 = scmp.ge.s32.totalorder %s16_s17, 4   ;;  %s757_s13 = smov %s608_s14 }
  0xf8   : > { %s758_s14 = smov %s698_s25  ;;  %s759_s15 = smov %s616_s16 }
  0xf9   : > { %s760_s16 = smov %s762_s20  ;;  %15 = sbr.rel (!%p13_p3) target bundleno = 4 (0x4), region = 73 }
  0xfe   :  { %372 = vsyncpa [#allocation3], 1 }
  0xff   :  { %374 = vsyncpa [#allocation3 + $0x1], 1 }

</bundles_post_ra>
